<compile_context>
chip_gen: v6e
topology: v6e:2x2x1
jax: 0.10.0
libtpu: 0.0.40
codegen_flags: <defaults>
</compile_context>

<pallas_src>
import jax
import jax.numpy as jnp
from jax.experimental import pallas as pl
from jax.experimental.pallas import tpu as pltpu


def _memorize_kernel(x_ref, logits_ref, out_ref):
    # x_ref:      (block_n, 1)       VMEM  — per-example scale column
    # logits_ref: (block_n, block_f) VMEM
    # out_ref:    (block_n, block_f) VMEM
    # Broadcast multiply along lanes — pure VPU work, lane-dense stores.
    out_ref[...] = logits_ref[...] * x_ref[...]


def _pick_block(dim, cap, align):
    """Block size for one dim.

    Full dim if it fits under `cap` (a full array dim always satisfies the
    (8,128) block-shape rule), otherwise the largest `align`-multiple <= cap
    (clamped to dim).  Trailing partial blocks are handled by Pallas, so no
    even-divisibility is required.
    """
    if dim <= cap:
        return dim
    blk = max((cap // align) * align, align)
    return min(blk, dim)


def memorization_forward(x, logits, *, donate_logits=False):
    """einsum('n, nsv -> nsv', x, logits) as a Pallas TPU kernel."""
    batch, seq_len, vocab = logits.shape
    if x.shape != (batch,):
        raise ValueError(f"Invalid input shape: {x.shape}, expected {(batch,)}")

    flat = seq_len * vocab
    logits2d = logits.reshape(batch, flat)
    x2d = x.reshape(batch, 1).astype(logits.dtype)
    itemsize = jnp.dtype(logits.dtype).itemsize

    # ---- Generation-aware VMEM budget -------------------------------------
    try:
        vmem_cap = int(pltpu.get_tpu_info().vmem_capacity_bytes)
    except Exception:  # unknown target: assume the smallest (v7x-sized) VMEM
        vmem_cap = 64 * 1024 * 1024
    if vmem_cap >= 100 * 1024 * 1024:
        # v5e / v6e: 128 MiB physical VMEM — big tiles, lift scoped default.
        tile_budget_bytes = 16 * 1024 * 1024
        vmem_limit_bytes = 96 * 1024 * 1024
    else:
        # v7x: 64 MiB physical VMEM per TC — double-buffered in+out is ~4x tile.
        tile_budget_bytes = 6 * 1024 * 1024
        vmem_limit_bytes = 48 * 1024 * 1024
    max_tile_elems = max(1, tile_budget_bytes // itemsize)

    # ---- Tile selection: rows first, lane dim from the budget, then regrow --
    block_n = _pick_block(batch, 8, 8)                       # modest row tile
    f_cap = max(128, max_tile_elems // block_n)
    block_f = _pick_block(flat, f_cap, 128)                  # as wide as fits
    n_cap = max(block_n, max_tile_elems // max(block_f, 1))
    block_n = _pick_block(batch, n_cap, 8)                   # use leftover budget

    # ---- Guarantee >=2 parallel blocks for big slabs (v7x megacore) --------
    total_bytes = batch * flat * itemsize
    if (pl.cdiv(batch, block_n) * pl.cdiv(flat, block_f) < 2
            and total_bytes >= (1 << 20) and flat >= 256):
        block_f = max(128, ((flat // 2 + 127) // 128) * 128)

    grid = (pl.cdiv(batch, block_n), pl.cdiv(flat, block_f))
    n_steps = grid[0] * grid[1]
    tile_bytes = block_n * block_f * itemsize

    # Deeper input buffering only when tiles are small and steps are many
    # (hides DMA issue latency; skipped when tiles are large).
    logits_spec_kwargs = {}
    if tile_bytes < (1 << 20) and n_steps >= 8:
        logits_spec_kwargs["pipeline_mode"] = pl.Buffered(3)

    # Pure streaming op: tell the XLA scheduler it is bandwidth-bound.
    cost = pl.CostEstimate(
        flops=batch * flat,
        transcendentals=0,
        bytes_accessed=2 * batch * flat * itemsize + batch * itemsize,
    )

    out2d = pl.pallas_call(
        _memorize_kernel,
        out_shape=jax.ShapeDtypeStruct((batch, flat), logits.dtype),
        grid=grid,
        in_specs=[
            pl.BlockSpec((block_n, 1), lambda i, j: (i, 0)),
            pl.BlockSpec((block_n, block_f), lambda i, j: (i, j),
                         **logits_spec_kwargs),
        ],
        out_specs=pl.BlockSpec((block_n, block_f), lambda i, j: (i, j)),
        compiler_params=pltpu.CompilerParams(
            dimension_semantics=("parallel", "parallel"),
            vmem_limit_bytes=vmem_limit_bytes,
        ),
        cost_estimate=cost,
        # Alias logits2d -> out2d only when the caller explicitly donates the
        # parameter buffer; the module's forward must not clobber its params.
        input_output_aliases=({1: 0} if donate_logits else {}),
    )(x2d, logits2d)

    return out2d.reshape(batch, seq_len, vocab)


if __name__ == "__main__":
    # Small shapes consistent with the module.
    batch_size, seq_len, vocab_size = 2, 8, 32

    # Deterministic parameter init (stands in for torch.randn in __init__).
    key = jax.random.PRNGKey(0)
    logits = jax.random.normal(
        key, (batch_size, seq_len, vocab_size), dtype=jnp.float32
    )

    # Forward input: all ones of shape (batch_size,), per module contract.
    x = jnp.ones((batch_size,), dtype=jnp.float32)

    # Host-side validation mirroring the torch module's checks.
    if x.shape != (batch_size,):
        raise ValueError(f"Invalid input shape: {x.shape}, expected {(batch_size,)}")
    if not bool(jnp.all(x == 1)):
        raise ValueError("All values of x should be 1")

    out = memorization_forward(x, logits)
    out = jax.block_until_ready(out)

    assert out.shape == (batch_size, seq_len, vocab_size)

    # Reference check: einsum('n, nsv -> nsv', x, logits).
    ref = jnp.einsum("n,nsv->nsv", x, logits)
    assert jnp.allclose(out, ref, atol=1e-6), "mismatch vs reference"

    print("KERNEL_OK")
</pallas_src>

<mosaic_0001>
module attributes {stable_mosaic.version = 11 : i64} {
  func.func @_memorize_kernel(%arg0: i32, %arg1: i32, %arg2: memref<2x1xf32, #tpu.memory_space<vmem>>, %arg3: memref<2x256xf32, #tpu.memory_space<vmem>>, %arg4: memref<2x256xf32, #tpu.memory_space<vmem>>) attributes {dimension_semantics = [#tpu.dimension_semantics<parallel>, #tpu.dimension_semantics<parallel>], iteration_bounds = array<i64: 1, 1>, scalar_prefetch = 0 : i64, scratch_operands = 0 : i64, tpu.core_type = #tpu.core_type<tc>, window_params = [{transform_indices = @transform_0, window_bounds = array<i64: 2, 1>}, {transform_indices = @transform_1, window_bounds = array<i64: 2, 256>}, {transform_indices = @transform_2, window_bounds = array<i64: 2, 256>}]} {
    %c0 = arith.constant 0 : index
    %c0_0 = arith.constant 0 : index
    %0 = vector.load %arg3[%c0, %c0_0] : memref<2x256xf32, #tpu.memory_space<vmem>>, vector<2x256xf32>
    %c0_1 = arith.constant 0 : index
    %c0_2 = arith.constant 0 : index
    %1 = vector.load %arg2[%c0_1, %c0_2] : memref<2x1xf32, #tpu.memory_space<vmem>>, vector<2x1xf32>
    %2 = vector.broadcast %1 : vector<2x1xf32> to vector<2x256xf32>
    %3 = arith.mulf %0, %2 : vector<2x256xf32>
    %c0_3 = arith.constant 0 : index
    %c0_4 = arith.constant 0 : index
    %4 = vector.load %arg4[%c0_3, %c0_4] : memref<2x256xf32, #tpu.memory_space<vmem>>, vector<2x256xf32>
    tpu.vector_store %arg4[%c0_3, %c0_4], %3 {strides = array<i32>} : memref<2x256xf32, #tpu.memory_space<vmem>>, vector<2x256xf32>,
    return
  }
  func.func @transform_0(%arg0: i32, %arg1: i32) -> (i32, i32) {
    %c0_i32 = arith.constant 0 : i32
    %c0_i32_0 = arith.constant 0 : i32
    return %arg0, %c0_i32 : i32, i32
  }
  func.func @transform_1(%arg0: i32, %arg1: i32) -> (i32, i32) {
    %c0_i32 = arith.constant 0 : i32
    return %arg0, %arg1 : i32, i32
  }
  func.func @transform_2(%arg0: i32, %arg1: i32) -> (i32, i32) {
    %c0_i32 = arith.constant 0 : i32
    return %arg0, %arg1 : i32, i32
  }
}

</mosaic_0001>

<bundles_post_ra>
// kernel: tpu_custom_call.1
= control target key start
LH: loop header
LB: loop body
LE: loop exit
PB: predicated region body
PF: predicated region fallthrough
CT: control target
= control target key end

     0   :  { %v68_v1 = vmov 0   ;;  %s95_s0 = inlined_call_operand.vmem [shape: f32[2,1], index: 0, kind: input, shape index: {}]   ;;  %s96_s1 = inlined_call_operand.vmem [shape: f32[2,256], index: 1, kind: input, shape index: {}]   ;;  %s97_s2 = inlined_call_operand.hbm [shape: f32[2,256], index: 2, kind: output, shape index: {}]  }
   0x1   :  { %v13_v0 = vld [vmem:[%s95_s0] sm:$0x3]  ;;  %45 = vset.pattern.permute.xlu0 %v68_v1 }
   0x2   :  { %7 = vsyncpa [#allocation3], 0  ;;  %16 = vperm.xlu0 %45, %v13_v0   ;;  %v69_v2 = vmov 269488144   ;;  %v21_v4 = vlaneseq  ;;  %v12_v9 = vld [vmem:[%s96_s1] sm:$0xf] }
   0x3   :  { %v19_v3 = vunpack.c.l.s4 %v69_v2  ;;  %s70_s13 = smov [#allocation2]  }
   0x4   :  { %v22_v6 = vshrl.u32 %v21_v4, 7  ;;  %s34_s14 = sshll.u32 %s70_s13, 4  ;;  %s35_s14 = int_to_ptr.vmem [resolvable:$true] %s34_s14 }
   0x5   :  { %v20_v5 = vunpack.c.0.s8 %v19_v3  ;;  %s46_s0 = scalar_lea.vmem %s35_s14, 64  ;;  %p51_p1 = scmp.lt.s32.totalorder %s35_s14, %s35_s14 }
   0x6   :  { %p47_p0 = scmp.ne.s32.totalorder %s35_s14, %s46_s0  ;;  %p52_p2 = scmp.lt.s32.totalorder %s46_s0, %s46_s0 }
   0x7   :  { %v23_v7 = vsub.s32 %v20_v5, %v22_v6 }
   0x8   :  { %p53_p3 = por %p52_p2, %p51_p1 }
   0xa   :  { %p54_p4 = pnand %p53_p3, %p47_p0 }
  0x7d   :  { %v17_v8 = vpop.permute.xlu0 %16 }
  0x7e   :  { %v24_v10 = vrot.slane %v17_v8, %v23_v7 }
  0x80   :  { %v26_v11 = vmul.f32 %v24_v10, %v12_v9 }
  0x82   :  { %27 = vst [vmem:[#allocation2] sm:$0xf] %v26_v11 }
  0x83   :  { %57 = shalt.err (!%p54_p4)
}
  0x84   :  { %37 = dma.vmem_to_hbm [thread:$0]  %s35_s14, 64, %s97_s2, [#allocation3]  }
  0x85   :  { %66 = dma.done.wait [#allocation3], 64  }
  0x86   :  { %67 = vsyncadd [#allocation3], 4294967232 }
  0x87   :  { %41 = vsyncpa [#allocation3], 1 }

</bundles_post_ra>
